<compile_context>
chip_gen: v7x
topology: tpu7x:2x2x1
jax: 0.10.0
libtpu: 0.0.40
codegen_flags: <defaults>
</compile_context>

<pallas_src>
import functools

import jax
import jax.numpy as jnp
from jax.experimental import pallas as pl
from jax.experimental.pallas import tpu as pltpu

_LANES = 128
_SUBLANES = 8
_GROUP = _LANES * _SUBLANES          # elements per (8, 128) vreg group
_MAX_GROUPS_PER_BLOCK = 256          # 256 groups = 2048 rows = 1 MiB f32 / input / step
_PAD_NEG = -30000.0                  # sigmoid(_PAD_NEG) == 0.0 exactly (f32/bf16/f16)


def _dice_sums_kernel(pred_ref, mask_ref, inter_ref, sump_ref, summ_ref):
    i = pl.program_id(1)             # reduction axis (innermost, "arbitrary")

    @pl.when(i == 0)
    def _():
        inter_ref[...] = jnp.zeros_like(inter_ref)
        sump_ref[...] = jnp.zeros_like(sump_ref)
        summ_ref[...] = jnp.zeros_like(summ_ref)

    # Cast to f32 in-kernel; the DMA stays in the native (possibly narrow) dtype.
    p = jax.nn.sigmoid(pred_ref[...].astype(jnp.float32))   # EUP
    m = mask_ref[...].astype(jnp.float32)

    # (groups, 8, 128) -> (8, 128): reduction over the leading (untiled) dim is
    # plain per-vreg VPU adds; no XLU full-reduce / scalar store in the loop.
    inter_ref[0] += jnp.sum(p * m, axis=0)
    sump_ref[0] += jnp.sum(p, axis=0)
    summ_ref[0] += jnp.sum(m, axis=0)


def _block_plan(n):
    """Static tiling plan -> (groups_per_block, blocks_per_split, num_splits)."""
    groups = pl.cdiv(n, _GROUP)
    nblocks = pl.cdiv(groups, _MAX_GROUPS_PER_BLOCK)
    num_splits = 2 if nblocks >= 2 else 1            # feed both TCs on v7x
    nblocks = pl.cdiv(nblocks, num_splits) * num_splits
    groups_per_block = pl.cdiv(groups, nblocks)      # balanced, minimal padding
    return groups_per_block, nblocks // num_splits, num_splits


@functools.partial(jax.jit, static_argnames=("smooth",))
def _dice_loss_single(pred, mask, smooth=1.0):
    n = pred.size
    gpb, bps, num_splits = _block_plan(n)
    groups_padded = gpb * bps * num_splits
    pad = groups_padded * _GROUP - n

    def prep(x, pad_value):
        if x.dtype == jnp.bool_:
            x = x.astype(jnp.float32)
        flat = x.reshape(-1)                         # free row-major reshape
        if pad:                                      # only for ragged tails
            flat = jnp.pad(flat, (0, pad), constant_values=pad_value)
        return flat.reshape(groups_padded, _SUBLANES, _LANES)

    pred3 = prep(pred, _PAD_NEG)                     # sigmoid(pad) == 0 -> no valid stream
    mask3 = prep(mask, 0)

    in_spec = pl.BlockSpec((gpb, _SUBLANES, _LANES),
                           lambda c, i: (c * bps + i, 0, 0))
    acc_spec = pl.BlockSpec((1, _SUBLANES, _LANES), lambda c, i: (c, 0, 0))
    acc_shape = jax.ShapeDtypeStruct((num_splits, _SUBLANES, _LANES), jnp.float32)

    inter, sump, summ = pl.pallas_call(
        _dice_sums_kernel,
        out_shape=(acc_shape, acc_shape, acc_shape),
        grid_spec=pltpu.PrefetchScalarGridSpec(
            num_scalar_prefetch=0,
            grid=(num_splits, bps),
            in_specs=[in_spec, in_spec],
            out_specs=(acc_spec, acc_spec, acc_spec),
        ),
        compiler_params=pltpu.CompilerParams(
            dimension_semantics=("parallel", "arbitrary")),
    )(pred3, mask3)

    intersection = jnp.sum(inter)
    union = jnp.sum(sump) + jnp.sum(summ)
    dice = (2.0 * intersection + smooth) / (union + smooth)
    return 1.0 - dice


def dice_loss(pred, mask, smooth=1.0):
    """Pallas-backed DiceLoss.forward (single array or list of arrays)."""
    if isinstance(pred, (list, tuple)):
        loss = 0.0
        for pr in pred:
            assert pr.shape == mask.shape, "pred and mask should have the same shape."
            loss = loss + _dice_loss_single(pr, mask, smooth=smooth)
        return loss / 4  # matches the PyTorch module (hard-coded /4)
    assert pred.shape == mask.shape, "pred and mask should have the same shape."
    return _dice_loss_single(pred, mask, smooth=smooth)


def _reference_dice_loss(pred, mask, smooth=1.0):
    p = jax.nn.sigmoid(pred.astype(jnp.float32))
    m = mask.astype(jnp.float32)
    intersection = jnp.sum(p * m)
    union = jnp.sum(p) + jnp.sum(m)
    return 1.0 - (2.0 * intersection + smooth) / (union + smooth)


if __name__ == "__main__":
    key = jax.random.PRNGKey(0)
    k1, k2, k3, k4, k5, k6, k7 = jax.random.split(key, 7)

    # 1) NCHW, exactly (8,128)-aligned -> no padding, single block, single split.
    B, C, H, W = 2, 4, 16, 16
    pred = jax.random.normal(k1, (B, C, H, W), jnp.float32)
    mask = (jax.random.uniform(k2, (B, C, H, W)) > 0.5).astype(jnp.float32)
    out = jax.block_until_ready(dice_loss(pred, mask))
    ref = _reference_dice_loss(pred, mask)
    assert jnp.allclose(out, ref, rtol=1e-4, atol=1e-5), (out, ref)

    # 2) ragged element count -> exercises the sigmoid-neutral tail padding.
    pred_r = jax.random.normal(k3, (2, 3, 17, 19), jnp.float32)
    mask_r = (jax.random.uniform(k4, (2, 3, 17, 19)) > 0.5).astype(jnp.float32)
    out_r = jax.block_until_ready(dice_loss(pred_r, mask_r))
    ref_r = _reference_dice_loss(pred_r, mask_r)
    assert jnp.allclose(out_r, ref_r, rtol=1e-4, atol=1e-5), (out_r, ref_r)

    # 3) larger input -> exercises multi-block accumulation + the 2-way
    #    "parallel" split (grid (2, 2) with this shape).
    pred_b = jax.random.normal(k5, (8, 8, 96, 96), jnp.bfloat16)
    mask_b = (jax.random.uniform(k6, (8, 8, 96, 96)) > 0.5).astype(jnp.float32)
    out_b = jax.block_until_ready(dice_loss(pred_b, mask_b))
    ref_b = _reference_dice_loss(pred_b, mask_b)
    assert jnp.allclose(out_b, ref_b, rtol=2e-4, atol=1e-5), (out_b, ref_b)

    # 4) list-of-preds path (divides by 4, matching the PyTorch module).
    pred2 = jax.random.normal(k7, (B, C, H, W), jnp.float32)
    out_list = jax.block_until_ready(dice_loss([pred, pred2], mask))
    ref_list = (_reference_dice_loss(pred, mask)
                + _reference_dice_loss(pred2, mask)) / 4
    assert jnp.allclose(out_list, ref_list, rtol=1e-4, atol=1e-5), (out_list, ref_list)

    print("KERNEL_OK")
</pallas_src>

<mosaic_0001>
module attributes {stable_mosaic.version = 11 : i64} {
  func.func @_dice_sums_kernel(%arg0: i32, %arg1: i32, %arg2: memref<2x8x128xf32, #tpu.memory_space<vmem>>, %arg3: memref<2x8x128xf32, #tpu.memory_space<vmem>>, %arg4: memref<1x8x128xf32, #tpu.memory_space<vmem>>, %arg5: memref<1x8x128xf32, #tpu.memory_space<vmem>>, %arg6: memref<1x8x128xf32, #tpu.memory_space<vmem>>) attributes {dimension_semantics = [#tpu.dimension_semantics<parallel>, #tpu.dimension_semantics<arbitrary>], iteration_bounds = array<i64: 1, 1>, scalar_prefetch = 0 : i64, scratch_operands = 0 : i64, tpu.core_type = #tpu.core_type<tc>, window_params = [{transform_indices = @transform_0, window_bounds = array<i64: 2, 8, 128>}, {transform_indices = @transform_1, window_bounds = array<i64: 2, 8, 128>}, {transform_indices = @transform_2, window_bounds = array<i64: 1, 8, 128>}, {transform_indices = @transform_3, window_bounds = array<i64: 1, 8, 128>}, {transform_indices = @transform_4, window_bounds = array<i64: 1, 8, 128>}]} {
    %c0_i32 = arith.constant 0 : i32
    %0 = arith.cmpi eq, %arg1, %c0_i32 : i32
    %1 = arith.extui %0 : i1 to i32
    %c0_i32_0 = arith.constant 0 : i32
    %2 = arith.cmpi ne, %1, %c0_i32_0 : i32
    scf.if %2 {
      %cst_27 = arith.constant 0.000000e+00 : f32
      %32 = vector.broadcast %cst_27 : f32 to vector<1x8x128xf32>
      %c0_28 = arith.constant 0 : index
      %c0_29 = arith.constant 0 : index
      %c0_30 = arith.constant 0 : index
      %33 = vector.load %arg4[%c0_28, %c0_29, %c0_30] : memref<1x8x128xf32, #tpu.memory_space<vmem>>, vector<1x8x128xf32>
      tpu.vector_store %arg4[%c0_28, %c0_29, %c0_30], %32 {strides = array<i32>} : memref<1x8x128xf32, #tpu.memory_space<vmem>>, vector<1x8x128xf32>,
      %cst_31 = arith.constant 0.000000e+00 : f32
      %34 = vector.broadcast %cst_31 : f32 to vector<1x8x128xf32>
      %c0_32 = arith.constant 0 : index
      %c0_33 = arith.constant 0 : index
      %c0_34 = arith.constant 0 : index
      %35 = vector.load %arg5[%c0_32, %c0_33, %c0_34] : memref<1x8x128xf32, #tpu.memory_space<vmem>>, vector<1x8x128xf32>
      tpu.vector_store %arg5[%c0_32, %c0_33, %c0_34], %34 {strides = array<i32>} : memref<1x8x128xf32, #tpu.memory_space<vmem>>, vector<1x8x128xf32>,
      %cst_35 = arith.constant 0.000000e+00 : f32
      %36 = vector.broadcast %cst_35 : f32 to vector<1x8x128xf32>
      %c0_36 = arith.constant 0 : index
      %c0_37 = arith.constant 0 : index
      %c0_38 = arith.constant 0 : index
      %37 = vector.load %arg6[%c0_36, %c0_37, %c0_38] : memref<1x8x128xf32, #tpu.memory_space<vmem>>, vector<1x8x128xf32>
      tpu.vector_store %arg6[%c0_36, %c0_37, %c0_38], %36 {strides = array<i32>} : memref<1x8x128xf32, #tpu.memory_space<vmem>>, vector<1x8x128xf32>,
    } else {
    }
    %c0 = arith.constant 0 : index
    %c0_1 = arith.constant 0 : index
    %c0_2 = arith.constant 0 : index
    %3 = vector.load %arg2[%c0, %c0_1, %c0_2] : memref<2x8x128xf32, #tpu.memory_space<vmem>>, vector<2x8x128xf32>
    %4 = arith.negf %3 : vector<2x8x128xf32>
    %5 = math.exp %4 : vector<2x8x128xf32>
    %cst = arith.constant 1.000000e+00 : f32
    %6 = vector.broadcast %cst : f32 to vector<2x8x128xf32>
    %7 = arith.addf %6, %5 : vector<2x8x128xf32>
    %8 = arith.divf %6, %7 : vector<2x8x128xf32>
    %c0_3 = arith.constant 0 : index
    %c0_4 = arith.constant 0 : index
    %c0_5 = arith.constant 0 : index
    %9 = vector.load %arg3[%c0_3, %c0_4, %c0_5] : memref<2x8x128xf32, #tpu.memory_space<vmem>>, vector<2x8x128xf32>
    %c0_6 = arith.constant 0 : index
    %c0_7 = arith.constant 0 : index
    %c0_8 = arith.constant 0 : index
    %10 = vector.load %arg4[%c0_6, %c0_7, %c0_8] : memref<1x8x128xf32, #tpu.memory_space<vmem>>, vector<1x8x128xf32>
    %11 = vector.shape_cast %10 : vector<1x8x128xf32> to vector<8x128xf32>
    %12 = arith.mulf %8, %9 : vector<2x8x128xf32>
    %cst_9 = arith.constant dense<0.000000e+00> : vector<8x128xf32>
    %13 = vector.multi_reduction <add>, %12, %cst_9 [0] : vector<2x8x128xf32> to vector<8x128xf32>
    %14 = arith.addf %11, %13 : vector<8x128xf32>
    %c0_10 = arith.constant 0 : index
    %c0_11 = arith.constant 0 : index
    %c0_12 = arith.constant 0 : index
    %15 = vector.load %arg4[%c0_10, %c0_11, %c0_12] : memref<1x8x128xf32, #tpu.memory_space<vmem>>, vector<1x8x128xf32>
    %16 = vector.shape_cast %15 : vector<1x8x128xf32> to vector<8x128xf32>
    %17 = vector.shape_cast %14 : vector<8x128xf32> to vector<1x8x128xf32>
    tpu.vector_store %arg4[%c0_10, %c0_11, %c0_12], %17 {strides = array<i32>} : memref<1x8x128xf32, #tpu.memory_space<vmem>>, vector<1x8x128xf32>,
    %c0_13 = arith.constant 0 : index
    %c0_14 = arith.constant 0 : index
    %c0_15 = arith.constant 0 : index
    %18 = vector.load %arg5[%c0_13, %c0_14, %c0_15] : memref<1x8x128xf32, #tpu.memory_space<vmem>>, vector<1x8x128xf32>
    %19 = vector.shape_cast %18 : vector<1x8x128xf32> to vector<8x128xf32>
    %cst_16 = arith.constant dense<0.000000e+00> : vector<8x128xf32>
    %20 = vector.multi_reduction <add>, %8, %cst_16 [0] : vector<2x8x128xf32> to vector<8x128xf32>
    %21 = arith.addf %19, %20 : vector<8x128xf32>
    %c0_17 = arith.constant 0 : index
    %c0_18 = arith.constant 0 : index
    %c0_19 = arith.constant 0 : index
    %22 = vector.load %arg5[%c0_17, %c0_18, %c0_19] : memref<1x8x128xf32, #tpu.memory_space<vmem>>, vector<1x8x128xf32>
    %23 = vector.shape_cast %22 : vector<1x8x128xf32> to vector<8x128xf32>
    %24 = vector.shape_cast %21 : vector<8x128xf32> to vector<1x8x128xf32>
    tpu.vector_store %arg5[%c0_17, %c0_18, %c0_19], %24 {strides = array<i32>} : memref<1x8x128xf32, #tpu.memory_space<vmem>>, vector<1x8x128xf32>,
    %c0_20 = arith.constant 0 : index
    %c0_21 = arith.constant 0 : index
    %c0_22 = arith.constant 0 : index
    %25 = vector.load %arg6[%c0_20, %c0_21, %c0_22] : memref<1x8x128xf32, #tpu.memory_space<vmem>>, vector<1x8x128xf32>
    %26 = vector.shape_cast %25 : vector<1x8x128xf32> to vector<8x128xf32>
    %cst_23 = arith.constant dense<0.000000e+00> : vector<8x128xf32>
    %27 = vector.multi_reduction <add>, %9, %cst_23 [0] : vector<2x8x128xf32> to vector<8x128xf32>
    %28 = arith.addf %26, %27 : vector<8x128xf32>
    %c0_24 = arith.constant 0 : index
    %c0_25 = arith.constant 0 : index
    %c0_26 = arith.constant 0 : index
    %29 = vector.load %arg6[%c0_24, %c0_25, %c0_26] : memref<1x8x128xf32, #tpu.memory_space<vmem>>, vector<1x8x128xf32>
    %30 = vector.shape_cast %29 : vector<1x8x128xf32> to vector<8x128xf32>
    %31 = vector.shape_cast %28 : vector<8x128xf32> to vector<1x8x128xf32>
    tpu.vector_store %arg6[%c0_24, %c0_25, %c0_26], %31 {strides = array<i32>} : memref<1x8x128xf32, #tpu.memory_space<vmem>>, vector<1x8x128xf32>,
    return
  }
  func.func @transform_0(%arg0: i32, %arg1: i32) -> (i32, i32, i32) {
    %c1_i32 = arith.constant 1 : i32
    %0 = arith.muli %arg0, %c1_i32 : i32
    %1 = arith.addi %0, %arg1 : i32
    %c0_i32 = arith.constant 0 : i32
    %c0_i32_0 = arith.constant 0 : i32
    %c0_i32_1 = arith.constant 0 : i32
    return %1, %c0_i32, %c0_i32_0 : i32, i32, i32
  }
  func.func @transform_1(%arg0: i32, %arg1: i32) -> (i32, i32, i32) {
    %c1_i32 = arith.constant 1 : i32
    %0 = arith.muli %arg0, %c1_i32 : i32
    %1 = arith.addi %0, %arg1 : i32
    %c0_i32 = arith.constant 0 : i32
    %c0_i32_0 = arith.constant 0 : i32
    %c0_i32_1 = arith.constant 0 : i32
    return %1, %c0_i32, %c0_i32_0 : i32, i32, i32
  }
  func.func @transform_2(%arg0: i32, %arg1: i32) -> (i32, i32, i32) {
    %c0_i32 = arith.constant 0 : i32
    %c0_i32_0 = arith.constant 0 : i32
    %c0_i32_1 = arith.constant 0 : i32
    return %arg0, %c0_i32, %c0_i32_0 : i32, i32, i32
  }
  func.func @transform_3(%arg0: i32, %arg1: i32) -> (i32, i32, i32) {
    %c0_i32 = arith.constant 0 : i32
    %c0_i32_0 = arith.constant 0 : i32
    %c0_i32_1 = arith.constant 0 : i32
    return %arg0, %c0_i32, %c0_i32_0 : i32, i32, i32
  }
  func.func @transform_4(%arg0: i32, %arg1: i32) -> (i32, i32, i32) {
    %c0_i32 = arith.constant 0 : i32
    %c0_i32_0 = arith.constant 0 : i32
    %c0_i32_1 = arith.constant 0 : i32
    return %arg0, %c0_i32, %c0_i32_0 : i32, i32, i32
  }
}

</mosaic_0001>

<bundles_post_ra>
// kernel: _dice_loss_single.1
= control target key start
LH: loop header
LB: loop body
LE: loop exit
PB: predicated region body
PF: predicated region fallthrough
CT: control target
= control target key end

     0   :  { %s176_s0 = inlined_call_operand.vmem [shape: f32[2,8,128], index: 0, kind: input, shape index: {}]   ;;  %s177_s1 = inlined_call_operand.vmem [shape: f32[2,8,128], index: 1, kind: input, shape index: {}]   ;;  %s178_s4 = inlined_call_operand.vmem [shape: f32[1,8,128], index: 4, kind: output, shape index: {2}]   ;;  %s179_s3 = inlined_call_operand.vmem [shape: f32[1,8,128], index: 3, kind: output, shape index: {1}]   ;;  %s180_s2 = inlined_call_operand.vmem [shape: f32[1,8,128], index: 2, kind: output, shape index: {0}]  }
   0x1   :  { %v65_v0 = vld [vmem:[%s176_s0] sm:$0xff]  ;;  %v66_v1 = vld [vmem:[%s176_s0 + $0x8] sm:$0xff] }
   0x2   :  { %v119_v2 = vmul.f32 -1.442695, %v65_v0  ;;  %v120_v3 = vmul.f32 -1.442695, %v66_v1  ;;  %v79_v4 = vld [vmem:[%s177_s1] sm:$0xff]  ;;  %v80_v5 = vld [vmem:[%s177_s1 + $0x8] sm:$0xff] }
   0x3   :  { %v92_v6 = vadd.f32 %v80_v5, %v79_v4 }
   0x4   :  { %122 = vpow2.f32 %v119_v2 }
   0x5   :  { %124 = vpow2.f32 %v120_v3  ;;  %94 = vst [vmem:[%s178_s4] sm:$0xff] %v92_v6 }
   0xe   :  { %v123_v7 = vpop.eup %122 }
   0xf   :  { %v125_v8 = vpop.eup %124  ;;  %v73_v9 = vadd.f32 1.0, %v123_v7 }
  0x10   :  { %v74_v10 = vadd.f32 1.0, %v125_v8 }
  0x11   :  { %126 = vrcp.f32 %v73_v9 }
  0x12   :  { %128 = vrcp.f32 %v74_v10 }
  0x1b   :  { %v127_v11 = vpop.eup %126 }
  0x1c   :  { %v129_v12 = vpop.eup %128  ;;  %v82_v13 = vmul.f32 %v127_v11, %v79_v4 }
  0x1d   :  { %v83_v14 = vmul.f32 %v129_v12, %v80_v5  ;;  %v88_v15 = vadd.f32 %v129_v12, %v127_v11 }
  0x1f   :  { %v84_v16 = vadd.f32 %v83_v14, %v82_v13  ;;  %90 = vst [vmem:[%s179_s3] sm:$0xff] %v88_v15 }
  0x21   :  { %86 = vst [vmem:[%s180_s2] sm:$0xff] %v84_v16 }

</bundles_post_ra>
